<compile_context>
chip_gen: v5e
topology: v5e:2x2
jax: 0.10.0
libtpu: 0.0.40
codegen_flags: <defaults>
</compile_context>

<pallas_src>
import jax
import jax.numpy as jnp
from jax.experimental import pallas as pl
from jax.experimental.pallas import tpu as pltpu


def _generator_kernel(z_ref, w1_ref, b1_ref, w2_ref, b2_ref, out_ref):
    # hidden = ReLU(z @ W1 + b1); bf16 MXU inputs, f32 accumulation.
    h = jnp.dot(z_ref[...], w1_ref[...], preferred_element_type=jnp.float32)
    h = jnp.maximum(h + b1_ref[...], 0.0)               # f32 bias + ReLU (VPU)
    # out = Sigmoid(h @ W2 + b2)
    o = jnp.dot(h.astype(jnp.bfloat16), w2_ref[...],
                preferred_element_type=jnp.float32)
    o = o + b2_ref[...]                                  # f32 bias
    # sigmoid(x) == 0.5*tanh(0.5*x)+0.5 -> single EUP transcendental, VALU free.
    out_ref[...] = (0.5 * jnp.tanh(0.5 * o) + 0.5).astype(out_ref.dtype)


_SINGLE_SHOT_VMEM_BUDGET = 8 * 1024 * 1024  # bytes; well under 32 MiB scoped default


def _cost_estimate(batch, nd, hidden, out_dim, out_bytes):
    flops = 2 * batch * (nd * hidden + hidden * out_dim)
    transcendentals = batch * out_dim  # one tanh per output element
    bytes_accessed = (batch * nd * 2                     # z (bf16 in)
                      + batch * out_dim * out_bytes      # output
                      + nd * hidden * 2 + hidden * out_dim * 2   # bf16 weights
                      + (hidden + out_dim) * 4)          # f32 biases
    return pl.CostEstimate(flops=flops, transcendentals=transcendentals,
                           bytes_accessed=bytes_accessed)


def generator_forward(z, w1, b1, w2, b2, slice_shape, *, batch_tile=512,
                      out_dtype=jnp.float32,
                      single_shot_budget_bytes=_SINGLE_SHOT_VMEM_BUDGET):
    """z: (B, noise_dim) -> (B, H, W) with (H, W) = slice_shape.

    w1/w2 are bf16 (in_features, out_features); b1/b2 are f32 (1, out_features).
    Small total footprints run single-shot (whole arrays in VMEM, no grid);
    large batches are padded to a multiple of `batch_tile` and run through a
    batch-tiled "parallel" grid (sharded across TensorCores on v7x).
    """
    B, nd = z.shape
    hidden = w1.shape[1]
    out_dim = w2.shape[1]
    assert out_dim == slice_shape[0] * slice_shape[1]
    out_bytes = jnp.dtype(out_dtype).itemsize

    # Producer-side bf16 cast: halves the z DMA, no in-kernel VPU cast.
    z_bf16 = z.astype(jnp.bfloat16)

    # Rough single-shot VMEM footprint: inputs + output + f32 intermediates.
    footprint = (B * nd * 2 + B * out_dim * out_bytes
                 + nd * hidden * 2 + hidden * out_dim * 2 + (hidden + out_dim) * 4
                 + 2 * B * max(hidden, out_dim) * 4)

    if B <= batch_tile or footprint <= single_shot_budget_bytes:
        # Single-shot: whole-array blocks resident in VMEM, no grid, no
        # pipeline prologue/epilogue.  Beats a short serial grid on v5e/v6e.
        vmem = pl.BlockSpec(memory_space=pltpu.MemorySpace.VMEM)
        out_flat = pl.pallas_call(
            _generator_kernel,
            out_shape=jax.ShapeDtypeStruct((B, out_dim), out_dtype),
            in_specs=[vmem, vmem, vmem, vmem, vmem],
            out_specs=vmem,
            cost_estimate=_cost_estimate(B, nd, hidden, out_dim, out_bytes),
        )(z_bf16, w1, b1, w2, b2)
    else:
        # Batched path: pad B to a tile multiple, tile the M (batch) dimension.
        # Weights/biases stay resident (index_map returns the same block every
        # step -> no re-DMA).  "parallel" shards batch tiles across v7x's 2 TCs.
        # TODO(synk): optionally round num_tiles up to an even count on v7x
        # (per-chip dispatch via pltpu.get_tpu_info()) so both TCs always get work.
        num_tiles = pl.cdiv(B, batch_tile)
        b_padded = num_tiles * batch_tile
        if b_padded != B:
            z_bf16 = jnp.pad(z_bf16, ((0, b_padded - B), (0, 0)))
        out_flat = pl.pallas_call(
            _generator_kernel,
            out_shape=jax.ShapeDtypeStruct((b_padded, out_dim), out_dtype),
            grid=(num_tiles,),
            in_specs=[
                pl.BlockSpec((batch_tile, nd), lambda i: (i, 0)),
                pl.BlockSpec((nd, hidden), lambda i: (0, 0)),
                pl.BlockSpec((1, hidden), lambda i: (0, 0)),
                pl.BlockSpec((hidden, out_dim), lambda i: (0, 0)),
                pl.BlockSpec((1, out_dim), lambda i: (0, 0)),
            ],
            out_specs=pl.BlockSpec((batch_tile, out_dim), lambda i: (i, 0)),
            compiler_params=pltpu.CompilerParams(
                dimension_semantics=("parallel",)),
            cost_estimate=_cost_estimate(b_padded, nd, hidden, out_dim, out_bytes),
        )(z_bf16, w1, b1, w2, b2)
        if b_padded != B:
            out_flat = out_flat[:B]

    # PyTorch: out.view(-1, *slice_shape) -- free reshape.
    return out_flat.reshape(-1, slice_shape[0], slice_shape[1])


def init_generator_params(key, noise_dim, slice_shape, hidden=128):
    """Same shapes/init scale as the nn.Module (PyTorch default Linear init
    bound is 1/sqrt(fan_in) for both weight and bias).  Weights stored bf16
    (MXU-native), biases f32, layout (in_features, out_features)."""
    out_dim = slice_shape[0] * slice_shape[1]
    k1, k2, k3, k4 = jax.random.split(key, 4)
    lim1 = 1.0 / (noise_dim ** 0.5)
    lim2 = 1.0 / (hidden ** 0.5)
    w1 = jax.random.uniform(k1, (noise_dim, hidden), jnp.float32, -lim1, lim1)
    b1 = jax.random.uniform(k2, (1, hidden), jnp.float32, -lim1, lim1)
    w2 = jax.random.uniform(k3, (hidden, out_dim), jnp.float32, -lim2, lim2)
    b2 = jax.random.uniform(k4, (1, out_dim), jnp.float32, -lim2, lim2)
    return w1.astype(jnp.bfloat16), b1, w2.astype(jnp.bfloat16), b2


def _ref_forward(z, w1, b1, w2, b2, slice_shape, out_dtype=jnp.float32):
    """Pure-JAX reference replicating the kernel numerics (bf16 MXU inputs,
    f32 accumulation, tanh-form sigmoid).  The bf16-weight quantization vs a
    true f32 PyTorch Linear is ~0.4% relative -- a documented deviation."""
    h = jnp.dot(z.astype(jnp.bfloat16), w1,
                preferred_element_type=jnp.float32) + b1
    h = jnp.maximum(h, 0.0)
    o = jnp.dot(h.astype(jnp.bfloat16), w2,
                preferred_element_type=jnp.float32) + b2
    s = 0.5 * jnp.tanh(0.5 * o) + 0.5
    return s.astype(out_dtype).reshape(-1, *slice_shape)


if __name__ == "__main__":
    noise_dim = 32
    slice_shape = (16, 16)

    key = jax.random.PRNGKey(0)
    k_params, k_z1, k_z2, k_z3 = jax.random.split(key, 4)
    w1, b1, w2, b2 = init_generator_params(k_params, noise_dim, slice_shape)

    # --- small batch: single-shot (no grid) path, f32 output ------------------
    z1 = jax.random.normal(k_z1, (8, noise_dim), jnp.float32)
    o1 = jax.block_until_ready(generator_forward(z1, w1, b1, w2, b2, slice_shape))
    r1 = _ref_forward(z1, w1, b1, w2, b2, slice_shape)
    assert o1.shape == (8, *slice_shape)
    assert jnp.allclose(o1, r1, atol=2e-3, rtol=2e-3)

    # --- ragged batch: padded, batch-tiled "parallel" grid path ---------------
    # (force the grid path at this small test size by zeroing the budget)
    z2 = jax.random.normal(k_z2, (1100, noise_dim), jnp.float32)
    o2 = jax.block_until_ready(
        generator_forward(z2, w1, b1, w2, b2, slice_shape,
                          batch_tile=512, single_shot_budget_bytes=0))
    r2 = _ref_forward(z2, w1, b1, w2, b2, slice_shape)
    assert o2.shape == (1100, *slice_shape)
    assert jnp.allclose(o2, r2, atol=2e-3, rtol=2e-3)

    # --- bf16 output option: halves the dominant HBM write stream -------------
    z3 = jax.random.normal(k_z3, (16, noise_dim), jnp.float32)
    o3 = jax.block_until_ready(
        generator_forward(z3, w1, b1, w2, b2, slice_shape, out_dtype=jnp.bfloat16))
    r3 = _ref_forward(z3, w1, b1, w2, b2, slice_shape, out_dtype=jnp.bfloat16)
    assert o3.dtype == jnp.bfloat16
    assert jnp.allclose(o3.astype(jnp.float32), r3.astype(jnp.float32),
                        atol=8e-3, rtol=8e-3)

    print("KERNEL_OK")
</pallas_src>

<mosaic_0001>
module attributes {stable_mosaic.version = 11 : i64} {
  func.func @_generator_kernel(%arg0: memref<8x32xbf16, #tpu.memory_space<vmem>>, %arg1: memref<32x128xbf16, #tpu.memory_space<vmem>>, %arg2: memref<1x128xf32, #tpu.memory_space<vmem>>, %arg3: memref<128x256xbf16, #tpu.memory_space<vmem>>, %arg4: memref<1x256xf32, #tpu.memory_space<vmem>>, %arg5: memref<8x256xf32, #tpu.memory_space<vmem>>) attributes {dimension_semantics = [], scalar_prefetch = 0 : i64, scratch_operands = 0 : i64, tpu.core_type = #tpu.core_type<tc>} {
    %c0 = arith.constant 0 : index
    %c0_0 = arith.constant 0 : index
    %0 = vector.load %arg0[%c0, %c0_0] : memref<8x32xbf16, #tpu.memory_space<vmem>>, vector<8x32xbf16>
    %c0_1 = arith.constant 0 : index
    %c0_2 = arith.constant 0 : index
    %1 = vector.load %arg1[%c0_1, %c0_2] : memref<32x128xbf16, #tpu.memory_space<vmem>>, vector<32x128xbf16>
    %cst = arith.constant dense<0.000000e+00> : vector<8x128xf32>
    %2 = tpu.matmul %0, %1, %cst {dimension_numbers = #tpu.dot_dimension_numbers<[1], [0], [0], [1], [0, 0, 1, 1], [], []>} : vector<8x32xbf16>, vector<32x128xbf16>, vector<8x128xf32> -> vector<8x128xf32>
    %c0_3 = arith.constant 0 : index
    %c0_4 = arith.constant 0 : index
    %3 = vector.load %arg2[%c0_3, %c0_4] : memref<1x128xf32, #tpu.memory_space<vmem>>, vector<1x128xf32>
    %4 = vector.broadcast %3 : vector<1x128xf32> to vector<8x128xf32>
    %5 = arith.addf %2, %4 : vector<8x128xf32>
    %cst_5 = arith.constant 0.000000e+00 : f32
    %6 = vector.broadcast %cst_5 : f32 to vector<8x128xf32>
    %7 = arith.maximumf %5, %6 : vector<8x128xf32>
    %8 = arith.truncf %7 : vector<8x128xf32> to vector<8x128xbf16>
    %c0_6 = arith.constant 0 : index
    %c0_7 = arith.constant 0 : index
    %9 = vector.load %arg3[%c0_6, %c0_7] : memref<128x256xbf16, #tpu.memory_space<vmem>>, vector<128x256xbf16>
    %cst_8 = arith.constant dense<0.000000e+00> : vector<8x256xf32>
    %10 = tpu.matmul %8, %9, %cst_8 {dimension_numbers = #tpu.dot_dimension_numbers<[1], [0], [0], [1], [0, 0, 1, 1], [], []>} : vector<8x128xbf16>, vector<128x256xbf16>, vector<8x256xf32> -> vector<8x256xf32>
    %c0_9 = arith.constant 0 : index
    %c0_10 = arith.constant 0 : index
    %11 = vector.load %arg4[%c0_9, %c0_10] : memref<1x256xf32, #tpu.memory_space<vmem>>, vector<1x256xf32>
    %12 = vector.broadcast %11 : vector<1x256xf32> to vector<8x256xf32>
    %13 = arith.addf %10, %12 : vector<8x256xf32>
    %cst_11 = arith.constant 5.000000e-01 : f32
    %14 = vector.broadcast %cst_11 : f32 to vector<8x256xf32>
    %15 = arith.mulf %14, %13 : vector<8x256xf32>
    %16 = math.tanh %15 : vector<8x256xf32>
    %cst_12 = arith.constant 5.000000e-01 : f32
    %17 = vector.broadcast %cst_12 : f32 to vector<8x256xf32>
    %18 = arith.mulf %17, %16 : vector<8x256xf32>
    %cst_13 = arith.constant 5.000000e-01 : f32
    %19 = vector.broadcast %cst_13 : f32 to vector<8x256xf32>
    %20 = arith.addf %18, %19 : vector<8x256xf32>
    %c0_14 = arith.constant 0 : index
    %c0_15 = arith.constant 0 : index
    %21 = vector.load %arg5[%c0_14, %c0_15] : memref<8x256xf32, #tpu.memory_space<vmem>>, vector<8x256xf32>
    tpu.vector_store %arg5[%c0_14, %c0_15], %20 {strides = array<i32>} : memref<8x256xf32, #tpu.memory_space<vmem>>, vector<8x256xf32>,
    return
  }
}

</mosaic_0001>

<bundles_post_ra>
// kernel: tpu_custom_call.1
= control target key start
LH: loop header
LB: loop body
LE: loop exit
PB: predicated region body
PF: predicated region fallthrough
CT: control target
= control target key end

     0   :  { %10 = vsyncpa [#allocation3], 0  ;;  %s525_s0 = inlined_call_operand.hbm [shape: bf16[8,32], index: 0, kind: input, shape index: {}]   ;;  %s526_s1 = inlined_call_operand.hbm [shape: bf16[32,128], index: 1, kind: input, shape index: {}]   ;;  %s527_s2 = inlined_call_operand.vmem [shape: f32[1,128], index: 2, kind: input, shape index: {}]   ;;  %s528_s3 = inlined_call_operand.hbm [shape: bf16[128,256], index: 3, kind: input, shape index: {}]   ;;  %s529_s4 = inlined_call_operand.vmem [shape: f32[1,256], index: 4, kind: input, shape index: {}]   ;;  %s530_s5 = inlined_call_operand.hbm [shape: f32[8,256], index: 5, kind: output, shape index: {}]  }
   0x1   :  { %11 = vsyncpa [#allocation6], 0  ;;  %s28_s20 = sshll.u32 %s526_s1, 4  ;;  %s29_s20 = int_to_ptr.hbm [resolvable:$true] %s28_s20 }
   0x2   :  { %12 = vsyncpa [#allocation4], 0  ;;  %s469_s21 = smov [#allocation5]   ;;  %s18_s25 = sshll.u32 %s525_s0, 4  ;;  %s19_s25 = int_to_ptr.hbm [resolvable:$true] %s18_s25 }
   0x3   :  { %s30_s22 = sshll.u32 %s469_s21, 4  ;;  %s470_s26 = smov 64   ;;  %s31_s22 = int_to_ptr.vmem [resolvable:$true] %s30_s22 }
   0x4   :  { %s471_s27 = smov 4   ;;  %s472_s28 = smov [#allocation2]  }
   0x5   :  { %36 = dma.hbm_to_vmem [thread:$0]  %s29_s20, 256, %s31_s22, [#allocation6], %s470_s26, %s470_s26, %s471_s27  }
   0x6   :  { %s20_s29 = sshll.u32 %s472_s28, 4  ;;  %s43_s7 = sshll.u32 %s528_s3, 4  ;;  %s21_s29 = int_to_ptr.vmem [resolvable:$true] %s20_s29  ;;  %s44_s7 = int_to_ptr.hbm [resolvable:$true] %s43_s7 }
   0x7   :  { %23 = dma.hbm_to_vmem [thread:$0]  %s19_s25, 64, %s21_s29, [#allocation3]  }
   0x8   :  { %s473_s1 = smov [#allocation7]   ;;  %s474_s9 = smov 128  }
   0x9   :  { %s45_s8 = sshll.u32 %s473_s1, 4  ;;  %s475_s10 = smov 8   ;;  %s46_s8 = int_to_ptr.vmem [resolvable:$true] %s45_s8 }
   0xa   :  { %51 = dma.hbm_to_vmem [thread:$0]  %s44_s7, 2048, %s46_s8, [#allocation6], %s474_s9, %s474_s9, %s475_s10  }
   0xb   :  { %463 = dma.done.wait [#allocation3], 64  }
   0xc   :  { %464 = vsyncadd [#allocation3], 4294967232 }
   0xd   :  { %465 = dma.done.wait [#allocation6], 2304  }
   0xe   :  { %466 = vsyncadd [#allocation6], 4294964992  ;;  %v337_v0 = vld [vmem:[#allocation5 + $0x8] sm:$0xff]  ;;  %v336_v1 = vld [vmem:[#allocation5] sm:$0xff]  ;;  %vm88_vm0 = vcmask 261120   ;;  %s252_s15 = sshll.u32 %s530_s5, 4  ;;  %s253_s15 = int_to_ptr.hbm [resolvable:$true] %s252_s15 }
   0xf   :  { %v330_v2 = vld [vmem:[#allocation7 + $0x70] sm:$0xf]  ;;  %v353_v3 = vld [vmem:[#allocation7 + $0x74] sm:$0xf0]  ;;  %v352_v4 = vld [vmem:[#allocation7 + $0x74] sm:$0xf]  ;;  %98 = vmatpush.bf16.msra.mxu0 %v337_v0 }
  0x10   :  { %v331_v5 = vor.u32 %v353_v3, %v330_v2  ;;  %v332_v6 = vld [vmem:[#allocation7 + $0x78] sm:$0xf0]  ;;  %v322_v7 = vld [vmem:[#allocation7 + $0x60] sm:$0xf]  ;;  %v351_v8 = vld [vmem:[#allocation7 + $0x64] sm:$0xf0] }
  0x11   :  { %v335_v9 = vor.u32 %v352_v4, %v332_v6  ;;  %v350_v10 = vld [vmem:[#allocation7 + $0x64] sm:$0xf]  ;;  %v324_v11 = vld [vmem:[#allocation7 + $0x68] sm:$0xf0]  ;;  %v323_v12 = vor.u32 %v351_v8, %v322_v7  ;;  %v314_v14 = vld [vmem:[#allocation7 + $0x50] sm:$0xf] }
  0x12   :  { %209 = vmatpush.bf16.msra.mxu1 %v331_v5  ;;  %v327_v13 = vor.u32 %v350_v10, %v324_v11  ;;  %v349_v15 = vld [vmem:[#allocation7 + $0x54] sm:$0xf0]  ;;  %v67_v16 = vld [vmem:[#allocation2] sm:$0xf]  ;;  %v348_v17 = vld [vmem:[#allocation7 + $0x54] sm:$0xf] }
  0x13   :  { %222 = vmatpush.bf16.msra.mxu2 %v335_v9  ;;  %99 = vmatpush.bf16.msra.mxu0 %v336_v1  ;;  %v316_v18 = vld [vmem:[#allocation7 + $0x58] sm:$0xf0]  ;;  %v315_v19 = vor.u32 %v349_v15, %v314_v14  ;;  %v306_v21 = vld [vmem:[#allocation7 + $0x40] sm:$0xf]  ;;  %v347_v22 = vld [vmem:[#allocation7 + $0x44] sm:$0xf0] }
  0x14   :  { %v319_v20 = vor.u32 %v348_v17, %v316_v18  ;;  %v346_v23 = vld [vmem:[#allocation7 + $0x44] sm:$0xf]  ;;  %v308_v24 = vld [vmem:[#allocation7 + $0x48] sm:$0xf0]  ;;  %v307_v25 = vor.u32 %v347_v22, %v306_v21  ;;  %v298_v27 = vld [vmem:[#allocation7 + $0x30] sm:$0xf] }
  0x15   :  { %v311_v26 = vor.u32 %v346_v23, %v308_v24  ;;  %v345_v28 = vld [vmem:[#allocation7 + $0x34] sm:$0xf0]  ;;  %v344_v29 = vld [vmem:[#allocation7 + $0x34] sm:$0xf]  ;;  %v300_v30 = vld [vmem:[#allocation7 + $0x38] sm:$0xf0] }
  0x16   :  { %210 = vmatpush.bf16.msra.mxu1 %v323_v12  ;;  %271 = vmatmul.msk.bf16.vlgmr.msra.gmra.mxu0 %vm88_vm0, %v67_v16  ;;  %v299_v31 = vor.u32 %v345_v28, %v298_v27  ;;  %v303_v32 = vor.u32 %v344_v29, %v300_v30  ;;  %v290_v33 = vld [vmem:[#allocation7 + $0x20] sm:$0xf]  ;;  %v343_v34 = vld [vmem:[#allocation7 + $0x24] sm:$0xf0]  ;;  %v342_v35 = vld [vmem:[#allocation7 + $0x24] sm:$0xf] }
  0x17   :  { %223 = vmatpush.bf16.msra.mxu2 %v327_v13  ;;  %v292_v36 = vld [vmem:[#allocation7 + $0x28] sm:$0xf0]  ;;  %v291_v37 = vor.u32 %v343_v34, %v290_v33  ;;  %v282_v39 = vld [vmem:[#allocation7 + $0x10] sm:$0xf]  ;;  %v341_v40 = vld [vmem:[#allocation7 + $0x14] sm:$0xf0] }
  0x18   :  { %v295_v38 = vor.u32 %v342_v35, %v292_v36  ;;  %v340_v41 = vld [vmem:[#allocation7 + $0x14] sm:$0xf]  ;;  %v283_v42 = vor.u32 %v341_v40, %v282_v39  ;;  %v284_v43 = vld [vmem:[#allocation7 + $0x18] sm:$0xf0]  ;;  %v274_v45 = vld [vmem:[#allocation7] sm:$0xf] }
  0x19   :  { %v287_v44 = vor.u32 %v340_v41, %v284_v43  ;;  %v339_v46 = vld [vmem:[#allocation7 + $0x4] sm:$0xf0]  ;;  %v338_v47 = vld [vmem:[#allocation7 + $0x4] sm:$0xf]  ;;  %v276_v49 = vld [vmem:[#allocation7 + $0x8] sm:$0xf0] }
  0x1a   :  { %211 = vmatpush.bf16.msra.mxu1 %v315_v19  ;;  %v275_v48 = vor.u32 %v339_v46, %v274_v45  ;;  %v279_v50 = vor.u32 %v338_v47, %v276_v49  ;;  %v362_v51 = vld [vmem:[%s527_s2] ss:$0 sm:$0xff]  ;;  %s476_s2 = smov [#allocation8]  }
  0x1b   :  { %224 = vmatpush.bf16.msra.mxu2 %v319_v20  ;;  %v123_v57 = vld [vmem:[%s529_s4] sm:$0x3]  ;;  %s250_s13 = sshll.u32 %s476_s2, 4  ;;  %s251_s13 = int_to_ptr.vmem [resolvable:$true] %s250_s13 }
  0x1c   :  { %v125_v58 = vperm.slane %v123_v57, 0  ;;  %v126_v62 = vperm.slane %v123_v57, 1 }
  0x1e   :  { %212 = vmatpush.bf16.msra.mxu1 %v307_v25 }
  0x1f   :  { %225 = vmatpush.bf16.msra.mxu2 %v311_v26 }
  0x22   :  { %213 = vmatpush.bf16.msra.mxu1 %v299_v31 }
  0x23   :  { %226 = vmatpush.bf16.msra.mxu2 %v303_v32 }
  0x26   :  { %214 = vmatpush.bf16.msra.mxu1 %v291_v37 }
  0x27   :  { %227 = vmatpush.bf16.msra.mxu2 %v295_v38 }
  0x2a   :  { %215 = vmatpush.bf16.msra.mxu1 %v283_v42 }
  0x2b   :  { %228 = vmatpush.bf16.msra.mxu2 %v287_v44 }
  0x2e   :  { %216 = vmatpush.bf16.msra.mxu1 %v275_v48 }
  0x2f   :  { %229 = vmatpush.bf16.msra.mxu2 %v279_v50 }
  0x93   :  { %v101_v52 = vpop.f32.mrf.mxu0 }
  0x94   :  { %v102_v53 = vadd.f32 %v362_v51, %v101_v52 }
  0x96   :  { %v105_v54 = vmax.f32 %v102_v53, 0.0 }
  0x98   :  { %v106_v55 = vpack.c.bf16 %v105_v54, %v105_v54 }
  0x9a   :  { %217 = vmatmul.bf16.vlgmr.msra.gmra.mxu1 %v106_v55  ;;  %230 = vmatmul.bf16.vlgmr.msra.gmra.mxu2 %v106_v55 }
  0x9b   :  { %v103_v56 = vpop.f32.mrf.mxu0 }
 0x117   :  { %v218_v59 = vpop.f32.mrf.mxu1 }
 0x118   :  { %v219_v60 = vadd.f32 %v218_v59, %v125_v58 }
 0x11a   :  { %v235_v61 = vmul.f32 0.5, %v219_v60 }
 0x11c   :  { %363 = vtanh.f32 %v235_v61 }
 0x11d   :  { %v231_v63 = vpop.f32.mrf.mxu2 }
 0x11e   :  { %v232_v0 = vadd.f32 %v231_v63, %v126_v62 }
 0x11f   :  { %v220_v1 = vpop.f32.mrf.mxu1 }
 0x120   :  { %v236_v2 = vmul.f32 0.5, %v232_v0 }
 0x122   :  { %v364_v3 = vpop.eup %363  ;;  %365 = vtanh.f32 %v236_v2 }
 0x123   :  { %v239_v4 = vmul.f32 0.5, %v364_v3 }
 0x125   :  { %v241_v5 = vadd.f32 0.5, %v239_v4  ;;  %v233_v6 = vpop.f32.mrf.mxu2 }
 0x127   :  { %243 = vst [vmem:[#allocation8] sm:$0xff] %v241_v5 }
 0x128   :  { %v366_v7 = vpop.eup %365 }
 0x129   :  { %v240_v8 = vmul.f32 0.5, %v366_v7 }
 0x12b   :  { %v242_v9 = vadd.f32 0.5, %v240_v8 }
 0x12d   :  { %244 = vst [vmem:[#allocation8 + $0x8] sm:$0xff] %v242_v9 }
 0x12e   :  { %255 = dma.vmem_to_hbm [thread:$0]  %s251_s13, 256, %s253_s15, [#allocation4]  }
 0x12f   :  { %467 = dma.done.wait [#allocation4], 256  }
 0x130   :  { %468 = vsyncadd [#allocation4], 4294967040 }
 0x131   :  { %260 = vsyncpa [#allocation3], 1 }
 0x132   :  { %261 = vsyncpa [#allocation6], 1 }
 0x133   :  { %262 = vsyncpa [#allocation4], 1 }

</bundles_post_ra>
